<compile_context>
chip_gen: v6e
topology: v6e:2x2x1
jax: 0.10.0
libtpu: 0.0.40
codegen_flags: <defaults>
</compile_context>

<pallas_src>
import functools

import jax
import jax.numpy as jnp
from jax.experimental import pallas as pl
from jax.experimental.pallas import tpu as pltpu

TILE_M = 512  # rows per grid step; (512,128) bf16 tiles keep VMEM tiny on v7x


def _residual_linear_kernel(x_ref, w_ref, b_ref, o_ref):
    """out = (x @ W + b) + x   -- bf16 matmul on MXU, f32 bias+residual on VPU."""
    x = x_ref[...]                                        # (TILE_M, D) bf16
    y = jnp.dot(x, w_ref[...],                            # MXU, f32 accumulate
                preferred_element_type=jnp.float32)
    y = y + b_ref[...].astype(jnp.float32)                # broadcast (1, D)
    o_ref[...] = (y + x.astype(jnp.float32)).astype(o_ref.dtype)


@functools.partial(jax.jit, static_argnames=("tile_m",))
def residual_add_linear(x, w, b, *, tile_m=TILE_M):
    """ResidualAdd(nn.Linear(D, D)) forward: fn(x) + x.

    x: (B, T, D), w: (D, D), b: (D,)  -> (B, T, D)
    """
    B, T, D = x.shape
    M = B * T

    # Lane-dense padding: last dim to a multiple of 128, rows to tile_m.
    D_pad = ((D + 127) // 128) * 128
    M_pad = ((M + tile_m - 1) // tile_m) * tile_m

    x2d = x.reshape(M, D)
    w_p, b_p = w, b
    if D_pad != D:
        x2d = jnp.pad(x2d, ((0, 0), (0, D_pad - D)))
        w_p = jnp.pad(w, ((0, D_pad - D), (0, D_pad - D)))
        b_p = jnp.pad(b, (0, D_pad - D))
    if M_pad != M:
        x2d = jnp.pad(x2d, ((0, M_pad - M), (0, 0)))
    b2d = b_p.reshape(1, D_pad)

    elt = jnp.dtype(x.dtype).itemsize
    cost = pl.CostEstimate(
        flops=2 * M_pad * D_pad * D_pad,
        transcendentals=0,
        bytes_accessed=(2 * M_pad * D_pad + D_pad * D_pad + D_pad) * elt,
    )

    out = pl.pallas_call(
        _residual_linear_kernel,
        out_shape=jax.ShapeDtypeStruct((M_pad, D_pad), x.dtype),
        grid_spec=pl.GridSpec(
            grid=(M_pad // tile_m,),
            in_specs=[
                pl.BlockSpec((tile_m, D_pad), lambda i: (i, 0)),   # x tile
                pl.BlockSpec((D_pad, D_pad), lambda i: (0, 0)),    # W resident
                pl.BlockSpec((1, D_pad), lambda i: (0, 0)),        # b resident
            ],
            out_specs=pl.BlockSpec((tile_m, D_pad), lambda i: (i, 0)),
        ),
        compiler_params=pltpu.CompilerParams(
            dimension_semantics=("parallel",),
            vmem_limit_bytes=32 * 1024 * 1024,
        ),
        input_output_aliases={0: 0},     # in-place residual semantics
        cost_estimate=cost,
    )(x2d, w_p, b2d)

    return out[:M, :D].reshape(B, T, D)


def _reference(x, w, b):
    xf = x.astype(jnp.float32)
    wf = w.astype(jnp.float32)
    bf = b.astype(jnp.float32)
    return jnp.einsum("btd,de->bte", xf, wf) + bf + xf


if __name__ == "__main__":
    # Small Conformer-like shapes: batch=2, seq=8, hidden=128 (lane-dense).
    B, T, D = 2, 8, 128
    key = jax.random.PRNGKey(0)
    kx, kw, kb = jax.random.split(key, 3)

    # bf16 operands feed the MXU at full rate and halve HBM traffic.
    x = jax.random.normal(kx, (B, T, D), dtype=jnp.bfloat16)
    w = (jax.random.normal(kw, (D, D), dtype=jnp.float32) * 0.1).astype(jnp.bfloat16)
    b = (jax.random.normal(kb, (D,), dtype=jnp.float32) * 0.1).astype(jnp.bfloat16)

    ref = _reference(x, w, b)

    out = residual_add_linear(x, w, b)
    out = jax.block_until_ready(out)

    assert out.shape == (B, T, D)
    assert jnp.allclose(out.astype(jnp.float32), ref, atol=5e-2, rtol=3e-2), \
        "mismatch vs reference"

    print("KERNEL_OK")
</pallas_src>

<mosaic_0001>
module attributes {stable_mosaic.version = 11 : i64} {
  func.func @_residual_linear_kernel(%arg0: i32, %arg1: memref<512x128xbf16, #tpu.memory_space<vmem>>, %arg2: memref<128x128xbf16, #tpu.memory_space<vmem>>, %arg3: memref<1x128xbf16, #tpu.memory_space<vmem>>, %arg4: memref<512x128xbf16, #tpu.memory_space<vmem>>) attributes {dimension_semantics = [#tpu.dimension_semantics<parallel>], iteration_bounds = array<i64: 1>, scalar_prefetch = 0 : i64, scratch_operands = 0 : i64, tpu.core_type = #tpu.core_type<tc>, window_params = [{transform_indices = @transform_0, window_bounds = array<i64: 512, 128>}, {pipeline_mode = #tpu.pipeline_mode<synchronous>, transform_indices = @transform_1, window_bounds = array<i64: 128, 128>}, {pipeline_mode = #tpu.pipeline_mode<synchronous>, transform_indices = @transform_2, window_bounds = array<i64: 1, 128>}, {transform_indices = @transform_3, window_bounds = array<i64: 512, 128>}]} {
    %c0 = arith.constant 0 : index
    %c0_0 = arith.constant 0 : index
    %0 = vector.load %arg1[%c0, %c0_0] : memref<512x128xbf16, #tpu.memory_space<vmem>>, vector<512x128xbf16>
    %c0_1 = arith.constant 0 : index
    %c0_2 = arith.constant 0 : index
    %1 = vector.load %arg2[%c0_1, %c0_2] : memref<128x128xbf16, #tpu.memory_space<vmem>>, vector<128x128xbf16>
    %cst = arith.constant dense<0.000000e+00> : vector<512x128xf32>
    %2 = tpu.matmul %0, %1, %cst {dimension_numbers = #tpu.dot_dimension_numbers<[1], [0], [0], [1], [0, 0, 1, 1], [], []>} : vector<512x128xbf16>, vector<128x128xbf16>, vector<512x128xf32> -> vector<512x128xf32>
    %c0_3 = arith.constant 0 : index
    %c0_4 = arith.constant 0 : index
    %3 = vector.load %arg3[%c0_3, %c0_4] : memref<1x128xbf16, #tpu.memory_space<vmem>>, vector<1x128xbf16>
    %4 = arith.extf %3 : vector<1x128xbf16> to vector<1x128xf32>
    %5 = vector.broadcast %4 : vector<1x128xf32> to vector<512x128xf32>
    %6 = arith.addf %2, %5 : vector<512x128xf32>
    %7 = arith.extf %0 : vector<512x128xbf16> to vector<512x128xf32>
    %8 = arith.addf %6, %7 : vector<512x128xf32>
    %9 = arith.truncf %8 : vector<512x128xf32> to vector<512x128xbf16>
    %c0_5 = arith.constant 0 : index
    %c0_6 = arith.constant 0 : index
    %10 = vector.load %arg4[%c0_5, %c0_6] : memref<512x128xbf16, #tpu.memory_space<vmem>>, vector<512x128xbf16>
    tpu.vector_store %arg4[%c0_5, %c0_6], %9 {strides = array<i32>} : memref<512x128xbf16, #tpu.memory_space<vmem>>, vector<512x128xbf16>,
    return
  }
  func.func @transform_0(%arg0: i32) -> (i32, i32) {
    %c0_i32 = arith.constant 0 : i32
    %c0_i32_0 = arith.constant 0 : i32
    return %arg0, %c0_i32 : i32, i32
  }
  func.func @transform_1(%arg0: i32) -> (i32, i32) {
    %c0_i32 = arith.constant 0 : i32
    %c0_i32_0 = arith.constant 0 : i32
    %c0_i32_1 = arith.constant 0 : i32
    return %c0_i32, %c0_i32_0 : i32, i32
  }
  func.func @transform_2(%arg0: i32) -> (i32, i32) {
    %c0_i32 = arith.constant 0 : i32
    %c0_i32_0 = arith.constant 0 : i32
    %c0_i32_1 = arith.constant 0 : i32
    return %c0_i32, %c0_i32_0 : i32, i32
  }
  func.func @transform_3(%arg0: i32) -> (i32, i32) {
    %c0_i32 = arith.constant 0 : i32
    %c0_i32_0 = arith.constant 0 : i32
    return %arg0, %c0_i32 : i32, i32
  }
}

</mosaic_0001>

<bundles_post_ra>
// kernel: residual_add_linear.1
= control target key start
LH: loop header
LB: loop body
LE: loop exit
PB: predicated region body
PF: predicated region fallthrough
CT: control target
= control target key end

     0   :  { %v97_v40 = vlaneseq  ;;  %s2114_s1 = inlined_call_operand.vmem [shape: bf16[128,128], index: 1, kind: input, shape index: {}]   ;;  %s2115_s0 = inlined_call_operand.vmem [shape: bf16[512,128], index: 0, kind: input, shape index: {}, may-alias: {0,3}]   ;;  %s2116_s2 = inlined_call_operand.vmem [shape: bf16[1,128], index: 2, kind: input, shape index: {}]   ;;  %s2117_s3 = inlined_call_operand.vmem [shape: bf16[512,128], index: 3, kind: output, shape index: {}, may-alias: {0,3}]  }
   0x1   :  { %v1577_v0 = vld [vmem:[%s2114_s1 + $0x38] sm:$0xff]   ;;  %v1578_v1 = vld [vmem:[%s2114_s1 + $0x30] sm:$0xff]   ;;  %v1579_v2 = vld [vmem:[%s2114_s1 + $0x28] sm:$0xff]  }
   0x2   :  { %1481 = vmatprep.subr.bf16.mxu0 %v1577_v0  ;;  %1561 = vmatprep.subr.bf16.mxu1 %v1577_v0  ;;  %v1580_v3 = vld [vmem:[%s2114_s1 + $0x20] sm:$0xff]   ;;  %v1581_v6 = vld [vmem:[%s2114_s1 + $0x18] sm:$0xff]   ;;  %v1582_v7 = vld [vmem:[%s2114_s1 + $0x10] sm:$0xff]   ;;  %v98_v41 = vshrl.u32 %v97_v40, 7 }
   0x3   :  { %1482 = vmatpush3.bf16.msra.mxu0 %v1577_v0  ;;  %1569 = vmatpush3.bf16.msra.mxu1 %v1577_v0  ;;  %v1684_v4 = vld [vmem:[%s2115_s0] sm:$0xff]   ;;  %v1583_v8 = vld [vmem:[%s2114_s1 + $0x8] sm:$0xff]   ;;  %v1718_v12 = vld [vmem:[%s2115_s0 + $0x10] sm:$0xff]  }
   0x4   :  { %1483 = vmatprep.subr.bf16.mxu0 %v1578_v1  ;;  %1562 = vmatprep.subr.bf16.mxu1 %v1578_v1  ;;  %v1689_v5 = vld [vmem:[%s2115_s0 + $0x80] sm:$0xff]   ;;  %v1708_v10 = vld [vmem:[%s2115_s0 + $0x8] sm:$0xff]   ;;  %v1723_v13 = vld [vmem:[%s2115_s0 + $0x90] sm:$0xff]   ;;  %v99_v44 = vsub.s32 0, %v98_v41  ;;  %v630_v57 = vunpack.c.l.bf16 %v1684_v4  ;;  %v631_v0 = vunpack.c.h.bf16 %v1684_v4 }
   0x5   :  { %1497 = vmatprep.mubr.bf16.mxu0 %v1684_v4  ;;  %1529 = vmatprep.mubr.bf16.mxu1 %v1689_v5  ;;  %v1584_v9 = vld [vmem:[%s2114_s1] sm:$0xff]   ;;  %v1713_v11 = vld [vmem:[%s2115_s0 + $0x88] sm:$0xff]   ;;  %v1732_v14 = vld [vmem:[%s2115_s0 + $0x18] sm:$0xff]   ;;  %v632_v49 = vunpack.c.l.bf16 %v1708_v10  ;;  %v633_v54 = vunpack.c.h.bf16 %v1708_v10  ;;  %v662_v59 = vunpack.c.l.bf16 %v1689_v5 }
   0x6   :  { %v1737_v15 = vld [vmem:[%s2115_s0 + $0x98] sm:$0xff]   ;;  %v1742_v16 = vld [vmem:[%s2115_s0 + $0x20] sm:$0xff]   ;;  %v1756_v18 = vld [vmem:[%s2115_s0 + $0x28] sm:$0xff]   ;;  %v664_v51 = vunpack.c.l.bf16 %v1713_v11  ;;  %v665_v55 = vunpack.c.h.bf16 %v1713_v11 }
   0x7   :  { %1484 = vmatpush3.bf16.msra.mxu0 %v1578_v1  ;;  %1570 = vmatpush3.bf16.msra.mxu1 %v1578_v1  ;;  %v1747_v17 = vld [vmem:[%s2115_s0 + $0xa0] sm:$0xff]   ;;  %v1761_v19 = vld [vmem:[%s2115_s0 + $0xa8] sm:$0xff]   ;;  %v1766_v20 = vld [vmem:[%s2115_s0 + $0x30] sm:$0xff]   ;;  %v663_v1 = vunpack.c.h.bf16 %v1689_v5 }
   0x8   :  { %1485 = vmatprep.subr.bf16.mxu0 %v1579_v2  ;;  %1563 = vmatprep.subr.bf16.mxu1 %v1579_v2  ;;  %v1771_v21 = vld [vmem:[%s2115_s0 + $0xb0] sm:$0xff]   ;;  %v1780_v22 = vld [vmem:[%s2115_s0 + $0x38] sm:$0xff]   ;;  %v1790_v24 = vld [vmem:[%s2115_s0 + $0x40] sm:$0xff]  }
   0x9   :  { %v1785_v23 = vld [vmem:[%s2115_s0 + $0xb8] sm:$0xff]   ;;  %v1795_v25 = vld [vmem:[%s2115_s0 + $0xc0] sm:$0xff]   ;;  %v1804_v26 = vld [vmem:[%s2115_s0 + $0x48] sm:$0xff]  }
   0xa   :  { %v1809_v27 = vld [vmem:[%s2115_s0 + $0xc8] sm:$0xff]   ;;  %v1814_v28 = vld [vmem:[%s2115_s0 + $0x50] sm:$0xff]   ;;  %v1828_v30 = vld [vmem:[%s2115_s0 + $0x58] sm:$0xff]  }
   0xb   :  { %1486 = vmatpush3.bf16.msra.mxu0 %v1579_v2  ;;  %1571 = vmatpush3.bf16.msra.mxu1 %v1579_v2  ;;  %v1819_v29 = vld [vmem:[%s2115_s0 + $0xd0] sm:$0xff]   ;;  %v1833_v31 = vld [vmem:[%s2115_s0 + $0xd8] sm:$0xff]   ;;  %v1838_v32 = vld [vmem:[%s2115_s0 + $0x60] sm:$0xff]  }
   0xc   :  { %1487 = vmatprep.subr.bf16.mxu0 %v1580_v3  ;;  %1564 = vmatprep.subr.bf16.mxu1 %v1580_v3  ;;  %v1843_v33 = vld [vmem:[%s2115_s0 + $0xe0] sm:$0xff]   ;;  %v1852_v34 = vld [vmem:[%s2115_s0 + $0x68] sm:$0xff]   ;;  %v1862_v36 = vld [vmem:[%s2115_s0 + $0x70] sm:$0xff]  }
   0xd   :  { %v1857_v35 = vld [vmem:[%s2115_s0 + $0xe8] sm:$0xff]   ;;  %v1867_v37 = vld [vmem:[%s2115_s0 + $0xf0] sm:$0xff]   ;;  %v1876_v38 = vld [vmem:[%s2115_s0 + $0x78] sm:$0xff]  }
   0xe   :  { %v1881_v39 = vld [vmem:[%s2115_s0 + $0xf8] sm:$0xff]   ;;  %v95_v42 = vld [vmem:[%s2116_s2] sm:$0x1] }
   0xf   :  { %1488 = vmatpush3.bf16.msra.mxu0 %v1580_v3  ;;  %1572 = vmatpush3.bf16.msra.mxu1 %v1580_v3  ;;  %v96_v43 = vunpack.c.l.bf16 %v95_v42 }
  0x10   :  { %1489 = vmatprep.subr.bf16.mxu0 %v1581_v6  ;;  %1565 = vmatprep.subr.bf16.mxu1 %v1581_v6 }
  0x11   :  { %v1888_v45 = vrot.slane %v96_v43, %v99_v44 }
  0x13   :  { %1490 = vmatpush3.bf16.msra.mxu0 %v1581_v6  ;;  %1573 = vmatpush3.bf16.msra.mxu1 %v1581_v6 }
  0x14   :  { %1491 = vmatprep.subr.bf16.mxu0 %v1582_v7  ;;  %1566 = vmatprep.subr.bf16.mxu1 %v1582_v7 }
  0x17   :  { %1492 = vmatpush3.bf16.msra.mxu0 %v1582_v7  ;;  %1574 = vmatpush3.bf16.msra.mxu1 %v1582_v7 }
  0x18   :  { %1493 = vmatprep.subr.bf16.mxu0 %v1583_v8  ;;  %1567 = vmatprep.subr.bf16.mxu1 %v1583_v8 }
  0x1b   :  { %1494 = vmatpush3.bf16.msra.mxu0 %v1583_v8  ;;  %1575 = vmatpush3.bf16.msra.mxu1 %v1583_v8 }
  0x1c   :  { %1495 = vmatprep.subr.bf16.mxu0 %v1584_v9  ;;  %1568 = vmatprep.subr.bf16.mxu1 %v1584_v9 }
  0x1f   :  { %1496 = vmatpush3.bf16.msra.mxu0 %v1584_v9  ;;  %1576 = vmatpush3.bf16.msra.mxu1 %v1584_v9 }
  0x22   :  { %1498 = vmatmul.mubr.bf16.vlgmr.msra.gmra.mxu0 %v1708_v10  ;;  %1530 = vmatmul.mubr.bf16.vlgmr.msra.gmra.mxu1 %v1713_v11 }
  0x23   :  { %1501 = vmatprep.mubr.bf16.mxu0 %v1718_v12  ;;  %1533 = vmatprep.mubr.bf16.mxu1 %v1723_v13 }
  0x2a   :  { %1502 = vmatmul.mubr.bf16.gmra.mxu0 %v1732_v14  ;;  %1534 = vmatmul.mubr.bf16.gmra.mxu1 %v1737_v15 }
  0x2b   :  { %1505 = vmatprep.mubr.bf16.mxu0 %v1742_v16  ;;  %1537 = vmatprep.mubr.bf16.mxu1 %v1747_v17 }
  0x32   :  { %1506 = vmatmul.mubr.bf16.gmra.mxu0 %v1756_v18  ;;  %1538 = vmatmul.mubr.bf16.gmra.mxu1 %v1761_v19 }
  0x33   :  { %1509 = vmatprep.mubr.bf16.mxu0 %v1766_v20  ;;  %1541 = vmatprep.mubr.bf16.mxu1 %v1771_v21 }
  0x3a   :  { %1510 = vmatmul.mubr.bf16.gmra.mxu0 %v1780_v22  ;;  %1542 = vmatmul.mubr.bf16.gmra.mxu1 %v1785_v23 }
  0x3b   :  { %1513 = vmatprep.mubr.bf16.mxu0 %v1790_v24  ;;  %1545 = vmatprep.mubr.bf16.mxu1 %v1795_v25 }
  0x42   :  { %1514 = vmatmul.mubr.bf16.gmra.mxu0 %v1804_v26  ;;  %1546 = vmatmul.mubr.bf16.gmra.mxu1 %v1809_v27 }
  0x43   :  { %1517 = vmatprep.mubr.bf16.mxu0 %v1814_v28  ;;  %1549 = vmatprep.mubr.bf16.mxu1 %v1819_v29 }
  0x4a   :  { %1518 = vmatmul.mubr.bf16.gmra.mxu0 %v1828_v30  ;;  %1550 = vmatmul.mubr.bf16.gmra.mxu1 %v1833_v31 }
  0x4b   :  { %1521 = vmatprep.mubr.bf16.mxu0 %v1838_v32  ;;  %1553 = vmatprep.mubr.bf16.mxu1 %v1843_v33 }
  0x52   :  { %1522 = vmatmul.mubr.bf16.gmra.mxu0 %v1852_v34  ;;  %1554 = vmatmul.mubr.bf16.gmra.mxu1 %v1857_v35 }
  0x53   :  { %1525 = vmatprep.mubr.bf16.mxu0 %v1862_v36  ;;  %1557 = vmatprep.mubr.bf16.mxu1 %v1867_v37 }
  0x5a   :  { %1526 = vmatmul.mubr.bf16.gmra.mxu0 %v1876_v38  ;;  %1558 = vmatmul.mubr.bf16.gmra.mxu1 %v1881_v39 }
  0xe2   :  { %v1499_v46 = vpop.f32.mrf.mxu0  ;;  %v1531_v47 = vpop.f32.mrf.mxu1 }
  0xe3   :  { %v384_v48 = vadd.f32 %v1499_v46, %v1888_v45  ;;  %v512_v50 = vadd.f32 %v1531_v47, %v1888_v45 }
  0xe4   :  { %v375_v52 = vpop.f32.mrf.mxu0  ;;  %v503_v53 = vpop.f32.mrf.mxu1 }
  0xe5   :  { %v376_v56 = vadd.f32 %v375_v52, %v1888_v45  ;;  %v504_v58 = vadd.f32 %v503_v53, %v1888_v45  ;;  %v696_v2 = vadd.f32 %v632_v49, %v384_v48  ;;  %v728_v3 = vadd.f32 %v664_v51, %v512_v50 }
  0xe6   :  { %v1500_v60 = vpop.f32.mrf.mxu0  ;;  %v1532_v61 = vpop.f32.mrf.mxu1  ;;  %v636_v48 = vunpack.c.l.bf16 %v1732_v14  ;;  %v668_v50 = vunpack.c.l.bf16 %v1737_v15 }
  0xe7   :  { %v387_v62 = vadd.f32 %v1500_v60, %v1888_v45  ;;  %v515_v63 = vadd.f32 %v1532_v61, %v1888_v45  ;;  %v694_v40 = vadd.f32 %v630_v57, %v376_v56  ;;  %v726_v41 = vadd.f32 %v662_v59, %v504_v58 }
  0xe8   :  { %v378_v6 = vpop.f32.mrf.mxu0  ;;  %v506_v7 = vpop.f32.mrf.mxu1  ;;  %v669_v56 = vunpack.c.h.bf16 %v1737_v15  ;;  %v634_v58 = vunpack.c.l.bf16 %v1718_v12  ;;  %v666_v60 = vunpack.c.l.bf16 %v1723_v13 }
  0xe9   :  { %v697_v8 = vadd.f32 %v633_v54, %v387_v62  ;;  %v729_v9 = vadd.f32 %v665_v55, %v515_v63  ;;  %v379_v10 = vadd.f32 %v378_v6, %v1888_v45  ;;  %v507_v11 = vadd.f32 %v506_v7, %v1888_v45 }
  0xea   :  { %v1503_v42 = vpop.f32.mrf.mxu0  ;;  %v1535_v43 = vpop.f32.mrf.mxu1  ;;  %v637_v55 = vunpack.c.h.bf16 %v1732_v14  ;;  %v635_v63 = vunpack.c.h.bf16 %v1718_v12 }
  0xeb   :  { %v1258_v44 = vpack.c.bf16 %v697_v8, %v696_v2  ;;  %v1338_v46 = vpack.c.bf16 %v729_v9, %v728_v3  ;;  %v695_v47 = vadd.f32 %v631_v0, %v379_v10  ;;  %v727_v4 = vadd.f32 %v663_v1, %v507_v11 }
  0xec   :  { %v400_v5 = vadd.f32 %v1503_v42, %v1888_v45  ;;  %v528_v49 = vadd.f32 %v1535_v43, %v1888_v45  ;;  %v391_v51 = vpop.f32.mrf.mxu0  ;;  %v519_v52 = vpop.f32.mrf.mxu1  ;;  %v667_v0 = vunpack.c.h.bf16 %v1723_v13 }
  0xed   :  { %1410 = vst [vmem:[%s2117_s3 + $0x8] sm:$0xff] %v1258_v44   ;;  %1426 = vst [vmem:[%s2117_s3 + $0x88] sm:$0xff] %v1338_v46   ;;  %v1253_v53 = vpack.c.bf16 %v695_v47, %v694_v40  ;;  %v1333_v54 = vpack.c.bf16 %v727_v4, %v726_v41  ;;  %v392_v57 = vadd.f32 %v391_v51, %v1888_v45  ;;  %v640_v47 = vunpack.c.l.bf16 %v1756_v18 }
  0xee   :  { %v520_v59 = vadd.f32 %v519_v52, %v1888_v45  ;;  %v1504_v61 = vpop.f32.mrf.mxu0  ;;  %v1536_v62 = vpop.f32.mrf.mxu1  ;;  %v700_v1 = vadd.f32 %v636_v48, %v400_v5  ;;  %v732_v2 = vadd.f32 %v668_v50, %v528_v49  ;;  %v672_v5 = vunpack.c.l.bf16 %v1761_v19 }
  0xef   :  { %1254 = vst [vmem:[%s2117_s3] sm:$0xff] %v1253_v53   ;;  %1425 = vst [vmem:[%s2117_s3 + $0x80] sm:$0xff] %v1333_v54   ;;  %v403_v14 = vadd.f32 %v1504_v61, %v1888_v45  ;;  %v531_v15 = vadd.f32 %v1536_v62, %v1888_v45  ;;  %v698_v11 = vadd.f32 %v634_v58, %v392_v57  ;;  %v641_v52 = vunpack.c.h.bf16 %v1756_v18 }
  0xf0   :  { %v394_v3 = vpop.f32.mrf.mxu0  ;;  %v522_v6 = vpop.f32.mrf.mxu1  ;;  %v730_v40 = vadd.f32 %v666_v60, %v520_v59  ;;  %v673_v53 = vunpack.c.h.bf16 %v1761_v19  ;;  %v670_v57 = vunpack.c.l.bf16 %v1747_v17  ;;  %v639_v60 = vunpack.c.h.bf16 %v1742_v16 }
  0xf1   :  { %v701_v7 = vadd.f32 %v637_v55, %v403_v14  ;;  %v733_v8 = vadd.f32 %v669_v56, %v531_v15  ;;  %v395_v9 = vadd.f32 %v394_v3, %v1888_v45  ;;  %v523_v10 = vadd.f32 %v522_v6, %v1888_v45 }
  0xf2   :  { %v1507_v41 = vpop.f32.mrf.mxu0  ;;  %v1539_v42 = vpop.f32.mrf.mxu1  ;;  %v638_v55 = vunpack.c.l.bf16 %v1742_v16  ;;  %v671_v61 = vunpack.c.h.bf16 %v1747_v17 }
  0xf3   :  { %v1268_v43 = vpack.c.bf16 %v701_v7, %v700_v1  ;;  %v1348_v44 = vpack.c.bf16 %v733_v8, %v732_v2  ;;  %v699_v46 = vadd.f32 %v635_v63, %v395_v9  ;;  %v731_v12 = vadd.f32 %v667_v0, %v523_v10 }
  0xf4   :  { %v416_v13 = vadd.f32 %v1507_v41, %v1888_v45  ;;  %v544_v4 = vadd.f32 %v1539_v42, %v1888_v45  ;;  %v407_v48 = vpop.f32.mrf.mxu0  ;;  %v535_v49 = vpop.f32.mrf.mxu1  ;;  %v644_v41 = vunpack.c.l.bf16 %v1780_v22 }
  0xf5   :  { %1412 = vst [vmem:[%s2117_s3 + $0x18] sm:$0xff] %v1268_v43   ;;  %1428 = vst [vmem:[%s2117_s3 + $0x98] sm:$0xff] %v1348_v44   ;;  %v1263_v50 = vpack.c.bf16 %v699_v46, %v698_v11  ;;  %v1343_v51 = vpack.c.bf16 %v731_v12, %v730_v40  ;;  %v408_v54 = vadd.f32 %v407_v48, %v1888_v45  ;;  %v676_v43 = vunpack.c.l.bf16 %v1785_v23 }
  0xf6   :  { %v536_v56 = vadd.f32 %v535_v49, %v1888_v45  ;;  %v1508_v58 = vpop.f32.mrf.mxu0  ;;  %v1540_v59 = vpop.f32.mrf.mxu1  ;;  %v704_v62 = vadd.f32 %v640_v47, %v416_v13  ;;  %v736_v14 = vadd.f32 %v672_v5, %v544_v4  ;;  %v645_v47 = vunpack.c.h.bf16 %v1780_v22 }
  0xf7   :  { %1411 = vst [vmem:[%s2117_s3 + $0x10] sm:$0xff] %v1263_v50   ;;  %1427 = vst [vmem:[%s2117_s3 + $0x90] sm:$0xff] %v1343_v51   ;;  %v419_v18 = vadd.f32 %v1508_v58, %v1888_v45  ;;  %v547_v19 = vadd.f32 %v1540_v59, %v1888_v45  ;;  %v702_v6 = vadd.f32 %v638_v55, %v408_v54  ;;  %v677_v4 = vunpack.c.h.bf16 %v1785_v23 }
  0xf8   :  { %v410_v15 = vpop.f32.mrf.mxu0  ;;  %v538_v63 = vpop.f32.mrf.mxu1  ;;  %v734_v7 = vadd.f32 %v670_v57, %v536_v56  ;;  %v642_v48 = vunpack.c.l.bf16 %v1766_v20  ;;  %v674_v50 = vunpack.c.l.bf16 %v1771_v21  ;;  %v675_v54 = vunpack.c.h.bf16 %v1771_v21 }
  0xf9   :  { %v705_v0 = vadd.f32 %v641_v52, %v419_v18  ;;  %v737_v1 = vadd.f32 %v673_v53, %v547_v19  ;;  %v411_v2 = vadd.f32 %v410_v15, %v1888_v45  ;;  %v539_v3 = vadd.f32 %v538_v63, %v1888_v45 }
  0xfa   :  { %v1511_v8 = vpop.f32.mrf.mxu0  ;;  %v1543_v9 = vpop.f32.mrf.mxu1  ;;  %v643_v53 = vunpack.c.h.bf16 %v1766_v20 }
  0xfb   :  { %v1278_v10 = vpack.c.bf16 %v705_v0, %v704_v62  ;;  %v1358_v11 = vpack.c.bf16 %v737_v1, %v736_v14  ;;  %v703_v40 = vadd.f32 %v639_v60, %v411_v2  ;;  %v735_v16 = vadd.f32 %v671_v61, %v539_v3 }
  0xfc   :  { %v432_v17 = vadd.f32 %v1511_v8, %v1888_v45  ;;  %v560_v42 = vadd.f32 %v1543_v9, %v1888_v45  ;;  %v423_v44 = vpop.f32.mrf.mxu0  ;;  %v551_v46 = vpop.f32.mrf.mxu1  ;;  %v648_v2 = vunpack.c.l.bf16 %v1804_v26 }
  0xfd   :  { %1414 = vst [vmem:[%s2117_s3 + $0x28] sm:$0xff] %v1278_v10   ;;  %1430 = vst [vmem:[%s2117_s3 + $0xa8] sm:$0xff] %v1358_v11   ;;  %v1273_v12 = vpack.c.bf16 %v703_v40, %v702_v6  ;;  %v1353_v13 = vpack.c.bf16 %v735_v16, %v734_v7  ;;  %v424_v5 = vadd.f32 %v423_v44, %v1888_v45  ;;  %v680_v6 = vunpack.c.l.bf16 %v1809_v27 }
  0xfe   :  { %v552_v49 = vadd.f32 %v551_v46, %v1888_v45  ;;  %v1512_v51 = vpop.f32.mrf.mxu0  ;;  %v1544_v52 = vpop.f32.mrf.mxu1  ;;  %v708_v55 = vadd.f32 %v644_v41, %v432_v17  ;;  %v740_v56 = vadd.f32 %v676_v43, %v560_v42  ;;  %v649_v11 = vunpack.c.h.bf16 %v1804_v26 }
  0xff   :  { %1413 = vst [vmem:[%s2117_s3 + $0x20] sm:$0xff] %v1273_v12   ;;  %1429 = vst [vmem:[%s2117_s3 + $0xa0] sm:$0xff] %v1353_v13   ;;  %v435_v22 = vadd.f32 %v1512_v51, %v1888_v45  ;;  %v563_v23 = vadd.f32 %v1544_v52, %v1888_v45  ;;  %v706_v61 = vadd.f32 %v642_v48, %v424_v5  ;;  %v681_v40 = vunpack.c.h.bf16 %v1809_v27 }
 0x100   :  { %v426_v57 = vpop.f32.mrf.mxu0  ;;  %v554_v58 = vpop.f32.mrf.mxu1  ;;  %v738_v62 = vadd.f32 %v674_v50, %v552_v49  ;;  %v646_v17 = vunpack.c.l.bf16 %v1790_v24  ;;  %v678_v42 = vunpack.c.l.bf16 %v1795_v25  ;;  %v647_v46 = vunpack.c.h.bf16 %v1790_v24 }
 0x101   :  { %v709_v59 = vadd.f32 %v645_v47, %v435_v22  ;;  %v741_v18 = vadd.f32 %v677_v4, %v563_v23  ;;  %v427_v19 = vadd.f32 %v426_v57, %v1888_v45  ;;  %v555_v60 = vadd.f32 %v554_v58, %v1888_v45 }
 0x102   :  { %v1515_v14 = vpop.f32.mrf.mxu0  ;;  %v1547_v15 = vpop.f32.mrf.mxu1  ;;  %v679_v12 = vunpack.c.h.bf16 %v1795_v25  ;;  %v652_v57 = vunpack.c.l.bf16 %v1828_v30 }
 0x103   :  { %v1288_v63 = vpack.c.bf16 %v709_v59, %v708_v55  ;;  %v1368_v0 = vpack.c.bf16 %v741_v18, %v740_v56  ;;  %v707_v1 = vadd.f32 %v643_v53, %v427_v19  ;;  %v739_v20 = vadd.f32 %v675_v54, %v555_v60 }
 0x104   :  { %v448_v21 = vadd.f32 %v1515_v14, %v1888_v45  ;;  %v576_v3 = vadd.f32 %v1547_v15, %v1888_v45  ;;  %v439_v7 = vpop.f32.mrf.mxu0  ;;  %v567_v8 = vpop.f32.mrf.mxu1  ;;  %v684_v59 = vunpack.c.l.bf16 %v1833_v31  ;;  %v685_v14 = vunpack.c.h.bf16 %v1833_v31 }
 0x105   :  { %1416 = vst [vmem:[%s2117_s3 + $0x38] sm:$0xff] %v1288_v63   ;;  %1432 = vst [vmem:[%s2117_s3 + $0xb8] sm:$0xff] %v1368_v0   ;;  %v1283_v9 = vpack.c.bf16 %v707_v1, %v706_v61  ;;  %v1363_v10 = vpack.c.bf16 %v739_v20, %v738_v62  ;;  %v440_v16 = vadd.f32 %v439_v7, %v1888_v45  ;;  %v653_v62 = vunpack.c.h.bf16 %v1828_v30 }
 0x106   :  { %v568_v41 = vadd.f32 %v567_v8, %v1888_v45  ;;  %v1516_v43 = vpop.f32.mrf.mxu0  ;;  %v1548_v44 = vpop.f32.mrf.mxu1  ;;  %v712_v13 = vadd.f32 %v648_v2, %v448_v21  ;;  %v744_v47 = vadd.f32 %v680_v6, %v576_v3  ;;  %v650_v63 = vunpack.c.l.bf16 %v1814_v28 }
 0x107   :  { %1415 = vst [vmem:[%s2117_s3 + $0x30] sm:$0xff] %v1283_v9   ;;  %1431 = vst [vmem:[%s2117_s3 + $0xb0] sm:$0xff] %v1363_v10   ;;  %v451_v26 = vadd.f32 %v1516_v43, %v1888_v45  ;;  %v579_v27 = vadd.f32 %v1548_v44, %v1888_v45  ;;  %v710_v52 = vadd.f32 %v646_v17, %v440_v16  ;;  %v682_v1 = vunpack.c.l.bf16 %v1819_v29 }
 0x108   :  { %v442_v4 = vpop.f32.mrf.mxu0  ;;  %v570_v5 = vpop.f32.mrf.mxu1  ;;  %v742_v22 = vadd.f32 %v678_v42, %v568_v41  ;;  %v651_v2 = vunpack.c.h.bf16 %v1814_v28  ;;  %v683_v3 = vunpack.c.h.bf16 %v1819_v29 }
 0x109   :  { %v713_v48 = vadd.f32 %v649_v11, %v451_v26  ;;  %v745_v49 = vadd.f32 %v681_v40, %v579_v27  ;;  %v443_v50 = vadd.f32 %v442_v4, %v1888_v45  ;;  %v571_v51 = vadd.f32 %v570_v5, %v1888_v45 }
 0x10a   :  { %v1519_v23 = vpop.f32.mrf.mxu0  ;;  %v1551_v53 = vpop.f32.mrf.mxu1 }
 0x10b   :  { %v1298_v54 = vpack.c.bf16 %v713_v48, %v712_v13  ;;  %v1378_v55 = vpack.c.bf16 %v745_v49, %v744_v47  ;;  %v711_v56 = vadd.f32 %v647_v46, %v443_v50  ;;  %v743_v24 = vadd.f32 %v679_v12, %v571_v51 }
 0x10c   :  { %v464_v25 = vadd.f32 %v1519_v23, %v1888_v45  ;;  %v592_v58 = vadd.f32 %v1551_v53, %v1888_v45  ;;  %v455_v18 = vpop.f32.mrf.mxu0  ;;  %v583_v19 = vpop.f32.mrf.mxu1  ;;  %v656_v46 = vunpack.c.l.bf16 %v1852_v34  ;;  %v688_v13 = vunpack.c.l.bf16 %v1857_v35 }
 0x10d   :  { %1418 = vst [vmem:[%s2117_s3 + $0x48] sm:$0xff] %v1298_v54   ;;  %1434 = vst [vmem:[%s2117_s3 + $0xc8] sm:$0xff] %v1378_v55   ;;  %v1293_v60 = vpack.c.bf16 %v711_v56, %v710_v52  ;;  %v1373_v61 = vpack.c.bf16 %v743_v24, %v742_v22  ;;  %v456_v15 = vadd.f32 %v455_v18, %v1888_v45  ;;  %v657_v49 = vunpack.c.h.bf16 %v1852_v34 }
 0x10e   :  { %v584_v0 = vadd.f32 %v583_v19, %v1888_v45  ;;  %v1520_v20 = vpop.f32.mrf.mxu0  ;;  %v1552_v21 = vpop.f32.mrf.mxu1  ;;  %v716_v6 = vadd.f32 %v652_v57, %v464_v25  ;;  %v748_v7 = vadd.f32 %v684_v59, %v592_v58  ;;  %v689_v50 = vunpack.c.h.bf16 %v1857_v35 }
 0x10f   :  { %1417 = vst [vmem:[%s2117_s3 + $0x40] sm:$0xff] %v1293_v60   ;;  %1433 = vst [vmem:[%s2117_s3 + $0xc0] sm:$0xff] %v1373_v61   ;;  %v467_v30 = vadd.f32 %v1520_v20, %v1888_v45  ;;  %v595_v31 = vadd.f32 %v1552_v21, %v1888_v45  ;;  %v714_v17 = vadd.f32 %v650_v63, %v456_v15  ;;  %v654_v52 = vunpack.c.l.bf16 %v1838_v32 }
 0x110   :  { %v458_v8 = vpop.f32.mrf.mxu0  ;;  %v586_v9 = vpop.f32.mrf.mxu1  ;;  %v746_v41 = vadd.f32 %v682_v1, %v584_v0  ;;  %v686_v23 = vunpack.c.l.bf16 %v1843_v33  ;;  %v655_v55 = vunpack.c.h.bf16 %v1838_v32  ;;  %v687_v56 = vunpack.c.h.bf16 %v1843_v33 }
 0x111   :  { %v717_v10 = vadd.f32 %v653_v62, %v467_v30  ;;  %v749_v11 = vadd.f32 %v685_v14, %v595_v31  ;;  %v459_v40 = vadd.f32 %v458_v8, %v1888_v45  ;;  %v587_v16 = vadd.f32 %v586_v9, %v1888_v45 }
 0x112   :  { %v1523_v42 = vpop.f32.mrf.mxu0  ;;  %v1555_v43 = vpop.f32.mrf.mxu1  ;;  %v660_v20 = vunpack.c.l.bf16 %v1876_v38  ;;  %v692_v30 = vunpack.c.l.bf16 %v1881_v39  ;;  %v693_v8 = vunpack.c.h.bf16 %v1881_v39 }
 0x113   :  { %v1308_v44 = vpack.c.bf16 %v717_v10, %v716_v6  ;;  %v1388_v26 = vpack.c.bf16 %v749_v11, %v748_v7  ;;  %v715_v27 = vadd.f32 %v651_v2, %v459_v40  ;;  %v747_v28 = vadd.f32 %v683_v3, %v587_v16 }
 0x114   :  { %v480_v29 = vadd.f32 %v1523_v42, %v1888_v45  ;;  %v608_v12 = vadd.f32 %v1555_v43, %v1888_v45  ;;  %v471_v47 = vpop.f32.mrf.mxu0  ;;  %v599_v4 = vpop.f32.mrf.mxu1  ;;  %v661_v7 = vunpack.c.h.bf16 %v1876_v38  ;;  %v658_v10 = vunpack.c.l.bf16 %v1862_v36 }
 0x115   :  { %1420 = vst [vmem:[%s2117_s3 + $0x58] sm:$0xff] %v1308_v44   ;;  %1436 = vst [vmem:[%s2117_s3 + $0xd8] sm:$0xff] %v1388_v26   ;;  %v1303_v5 = vpack.c.bf16 %v715_v27, %v714_v17  ;;  %v1383_v48 = vpack.c.bf16 %v747_v28, %v746_v41  ;;  %v472_v51 = vadd.f32 %v471_v47, %v1888_v45  ;;  %v690_v40 = vunpack.c.l.bf16 %v1867_v37 }
 0x116   :  { %v600_v22 = vadd.f32 %v599_v4, %v1888_v45  ;;  %v1524_v53 = vpop.f32.mrf.mxu0  ;;  %v1556_v54 = vpop.f32.mrf.mxu1  ;;  %v720_v24 = vadd.f32 %v656_v46, %v480_v29  ;;  %v752_v25 = vadd.f32 %v688_v13, %v608_v12  ;;  %v659_v41 = vunpack.c.h.bf16 %v1862_v36 }
 0x117   :  { %1419 = vst [vmem:[%s2117_s3 + $0x50] sm:$0xff] %v1303_v5   ;;  %1435 = vst [vmem:[%s2117_s3 + $0xd0] sm:$0xff] %v1383_v48   ;;  %v483_v34 = vadd.f32 %v1524_v53, %v1888_v45  ;;  %v611_v35 = vadd.f32 %v1556_v54, %v1888_v45  ;;  %v718_v61 = vadd.f32 %v654_v52, %v472_v51  ;;  %v691_v42 = vunpack.c.h.bf16 %v1867_v37 }
 0x118   :  { %v474_v57 = vpop.f32.mrf.mxu0  ;;  %v602_v58 = vpop.f32.mrf.mxu1  ;;  %v750_v62 = vadd.f32 %v686_v23, %v600_v22 }
 0x119   :  { %v721_v59 = vadd.f32 %v657_v49, %v483_v34  ;;  %v753_v18 = vadd.f32 %v689_v50, %v611_v35  ;;  %v475_v19 = vadd.f32 %v474_v57, %v1888_v45  ;;  %v603_v60 = vadd.f32 %v602_v58, %v1888_v45 }
 0x11a   :  { %v1527_v14 = vpop.f32.mrf.mxu0  ;;  %v1559_v15 = vpop.f32.mrf.mxu1 }
 0x11b   :  { %v1318_v63 = vpack.c.bf16 %v721_v59, %v720_v24  ;;  %v1398_v0 = vpack.c.bf16 %v753_v18, %v752_v25  ;;  %v719_v1 = vadd.f32 %v655_v55, %v475_v19  ;;  %v751_v32 = vadd.f32 %v687_v56, %v603_v60 }
 0x11c   :  { %v496_v33 = vadd.f32 %v1527_v14, %v1888_v45  ;;  %v624_v21 = vadd.f32 %v1559_v15, %v1888_v45  ;;  %v487_v31 = vpop.f32.mrf.mxu0  ;;  %v615_v2 = vpop.f32.mrf.mxu1 }
 0x11d   :  { %1422 = vst [vmem:[%s2117_s3 + $0x68] sm:$0xff] %v1318_v63   ;;  %1438 = vst [vmem:[%s2117_s3 + $0xe8] sm:$0xff] %v1398_v0   ;;  %v1313_v3 = vpack.c.bf16 %v719_v1, %v718_v61  ;;  %v1393_v6 = vpack.c.bf16 %v751_v32, %v750_v62  ;;  %v488_v9 = vadd.f32 %v487_v31, %v1888_v45 }
 0x11e   :  { %v616_v11 = vadd.f32 %v615_v2, %v1888_v45  ;;  %v1528_v16 = vpop.f32.mrf.mxu0  ;;  %v1560_v17 = vpop.f32.mrf.mxu1  ;;  %v724_v43 = vadd.f32 %v660_v20, %v496_v33  ;;  %v756_v44 = vadd.f32 %v692_v30, %v624_v21 }
 0x11f   :  { %1421 = vst [vmem:[%s2117_s3 + $0x60] sm:$0xff] %v1313_v3   ;;  %1437 = vst [vmem:[%s2117_s3 + $0xe0] sm:$0xff] %v1393_v6   ;;  %v499_v38 = vadd.f32 %v1528_v16, %v1888_v45  ;;  %v627_v39 = vadd.f32 %v1560_v17, %v1888_v45  ;;  %v722_v13 = vadd.f32 %v658_v10, %v488_v9 }
 0x120   :  { %v490_v26 = vpop.f32.mrf.mxu0  ;;  %v618_v27 = vpop.f32.mrf.mxu1  ;;  %v754_v47 = vadd.f32 %v690_v40, %v616_v11 }
 0x121   :  { %v725_v28 = vadd.f32 %v661_v7, %v499_v38  ;;  %v757_v29 = vadd.f32 %v693_v8, %v627_v39  ;;  %v491_v46 = vadd.f32 %v490_v26, %v1888_v45  ;;  %v619_v12 = vadd.f32 %v618_v27, %v1888_v45 }
 0x123   :  { %v1328_v4 = vpack.c.bf16 %v725_v28, %v724_v43  ;;  %v1408_v5 = vpack.c.bf16 %v757_v29, %v756_v44  ;;  %v723_v48 = vadd.f32 %v659_v41, %v491_v46  ;;  %v755_v49 = vadd.f32 %v691_v42, %v619_v12 }
 0x125   :  { %1424 = vst [vmem:[%s2117_s3 + $0x78] sm:$0xff] %v1328_v4   ;;  %1440 = vst [vmem:[%s2117_s3 + $0xf8] sm:$0xff] %v1408_v5   ;;  %v1323_v36 = vpack.c.bf16 %v723_v48, %v722_v13  ;;  %v1403_v37 = vpack.c.bf16 %v755_v49, %v754_v47 }
 0x127   :  { %1423 = vst [vmem:[%s2117_s3 + $0x70] sm:$0xff] %v1323_v36   ;;  %1439 = vst [vmem:[%s2117_s3 + $0xf0] sm:$0xff] %v1403_v37  }

</bundles_post_ra>
